<compile_context>
chip_gen: v5e
topology: v5e:2x2
jax: 0.10.0
libtpu: 0.0.40
codegen_flags: <defaults>
</compile_context>

<pallas_src>
import math

import jax
import jax.numpy as jnp
from jax.experimental import pallas as pl
from jax.experimental.pallas import tpu as pltpu


_LANES = 128
_MAP_BLOCK_BYTES = 2 * 1024 * 1024      # ~2 MiB per operand block (map kernel)
_REDUCE_BLOCK_BYTES = 1 * 1024 * 1024   # ~1 MiB per operand block (reduce kernel)
_VMEM_LIMIT_BYTES = 32 * 1024 * 1024    # safe on v5e/v6e/v7x


def _min_sublane(dtype):
    """Minimum sublane tile for a dtype (8 for 4B, 16 for 2B, 32 for 1B)."""
    itemsize = max(1, jnp.dtype(dtype).itemsize)
    return max(8, 32 // itemsize)


def _plan_tiles(n_elems, dtype, target_block_bytes):
    """Plan a lane-dense (rows, 128) tiling for one flattened group.

    Returns (rows, block_rows, num_blocks).  `rows` is the minimal row count
    (cdiv(n_elems, 128)); the array is NOT padded to a block multiple — the
    partial final block is handled by Pallas (map) or in-kernel masking
    (reduce).  block_rows is a multiple of the dtype's min sublane tile.
    """
    itemsize = max(1, jnp.dtype(dtype).itemsize)
    sub = _min_sublane(dtype)
    rows = max(1, pl.cdiv(n_elems, _LANES))
    block_rows = max(sub, (target_block_bytes // (_LANES * itemsize)) // sub * sub)
    if block_rows >= rows:
        # Whole array would be one block: split in two (rounded to the sublane
        # tile) when there is enough work, so both v7x TensorCores engage.
        if rows > sub:
            block_rows = pl.cdiv(pl.cdiv(rows, 2), sub) * sub
        else:
            block_rows = sub
    num_blocks = pl.cdiv(rows, block_rows)
    return rows, block_rows, num_blocks


def _out_float_dtype(*arrays):
    dt = jnp.result_type(*[a.dtype for a in arrays])
    return dt if jnp.issubdtype(dt, jnp.floating) else jnp.float32


# ---------------------------------------------------------------------------
# Kernel 1: full score map (reduction='none') on a lane-dense 2D view.
# ---------------------------------------------------------------------------
def _sqerr_map_kernel(p_ref, t_ref, o_ref):
    d = p_ref[...].astype(jnp.float32) - t_ref[...].astype(jnp.float32)
    o_ref[...] = (d * d).astype(o_ref.dtype)


def sqerr_map(y_pred, y_true):
    shape = y_pred.shape
    in_dtype = jnp.result_type(y_pred.dtype, y_true.dtype)
    out_dtype = _out_float_dtype(y_pred, y_true)
    total = y_pred.size
    rows, block_rows, num_blocks = _plan_tiles(total, in_dtype, _MAP_BLOCK_BYTES)
    pad = rows * _LANES - total   # < 128 elements; zero when total % 128 == 0

    def prep(x):
        flat = x.reshape(-1)
        if pad:
            flat = jnp.pad(flat, (0, pad))
        return flat.reshape(rows, _LANES)

    p2, t2 = prep(y_pred), prep(y_true)
    in_bytes = total * jnp.dtype(in_dtype).itemsize
    out_bytes = total * jnp.dtype(out_dtype).itemsize

    out2 = pl.pallas_call(
        _sqerr_map_kernel,
        out_shape=jax.ShapeDtypeStruct((rows, _LANES), out_dtype),
        grid=(num_blocks,),
        in_specs=[
            pl.BlockSpec((block_rows, _LANES), lambda b: (b, 0)),
            pl.BlockSpec((block_rows, _LANES), lambda b: (b, 0)),
        ],
        out_specs=pl.BlockSpec((block_rows, _LANES), lambda b: (b, 0)),
        compiler_params=pltpu.CompilerParams(
            dimension_semantics=("parallel",),
            vmem_limit_bytes=_VMEM_LIMIT_BYTES,
        ),
        cost_estimate=pl.CostEstimate(
            flops=2 * total, transcendentals=0,
            bytes_accessed=2 * in_bytes + out_bytes),
    )(p2, t2)

    if pad:
        return out2.reshape(-1)[:total].reshape(shape)
    return out2.reshape(shape)   # fast path: pure reshape, no copy


# ---------------------------------------------------------------------------
# Kernel 2: fused score map + per-group partial sums.
# Each grid step reduces one (block_rows, 128) tile of one group down to an
# (8, 128) partial (pure vreg adds, no per-step cross-lane reduce) and writes
# it to a distinct output block, so both grid axes are "parallel".
# The tail block is masked in-kernel (flat index < L), so no pad-to-block and
# no dependence on zero padding.  The tiny final reduction happens in XLA.
# ---------------------------------------------------------------------------
def sqerr_group_sums(p2d, t2d):
    """p2d, t2d: (G, L) -> per-group sum of squared error, shape (G,) f32."""
    G, L = p2d.shape
    in_dtype = jnp.result_type(p2d.dtype, t2d.dtype)
    rows, block_rows, num_blocks = _plan_tiles(L, in_dtype, _REDUCE_BLOCK_BYTES)
    pad = rows * _LANES - L   # < 128 elements; only for the reshape itself

    def prep(x):
        if pad:
            x = jnp.pad(x, ((0, 0), (0, pad)))
        return x.reshape(G, rows, _LANES)

    p3, t3 = prep(p2d), prep(t2d)

    # Mask whenever the grid can touch elements with flat index >= L
    # (zero-pad region and/or Pallas partial-block garbage beyond `rows`).
    needs_mask = (num_blocks * block_rows * _LANES) > L

    def kernel(p_ref, t_ref, o_ref):
        b = pl.program_id(1)
        d = p_ref[0].astype(jnp.float32) - t_ref[0].astype(jnp.float32)
        d2 = d * d
        if needs_mask:
            row = jax.lax.broadcasted_iota(jnp.int32, (block_rows, _LANES), 0)
            lane = jax.lax.broadcasted_iota(jnp.int32, (block_rows, _LANES), 1)
            flat = (b * block_rows + row) * _LANES + lane
            d2 = jnp.where(flat < L, d2, jnp.float32(0.0))
        part = jnp.sum(d2.reshape(block_rows // 8, 8, _LANES), axis=0)  # (8,128)
        o_ref[0, 0] = part

    in_bytes = G * L * jnp.dtype(in_dtype).itemsize
    out_bytes = G * num_blocks * 8 * _LANES * 4

    partials = pl.pallas_call(
        kernel,
        out_shape=jax.ShapeDtypeStruct((G, num_blocks, 8, _LANES), jnp.float32),
        grid=(G, num_blocks),
        in_specs=[
            pl.BlockSpec((1, block_rows, _LANES), lambda g, b: (g, b, 0)),
            pl.BlockSpec((1, block_rows, _LANES), lambda g, b: (g, b, 0)),
        ],
        out_specs=pl.BlockSpec((1, 1, 8, _LANES), lambda g, b: (g, b, 0, 0)),
        compiler_params=pltpu.CompilerParams(
            dimension_semantics=("parallel", "parallel"),
            vmem_limit_bytes=_VMEM_LIMIT_BYTES,
        ),
        cost_estimate=pl.CostEstimate(
            flops=3 * G * L, transcendentals=0,
            bytes_accessed=2 * in_bytes + out_bytes),
    )(p3, t3)
    # Tiny final reduction (G * num_blocks * 1024 f32) done in XLA.
    return jnp.sum(partials, axis=(1, 2, 3))


# ---------------------------------------------------------------------------
# BaseMetric equivalent (reduction bookkeeping == plain-Python / JAX glue).
# ---------------------------------------------------------------------------
def check_axes(x, axes):
    if axes is None:
        return tuple(range(x.ndim))
    if isinstance(axes, int):
        axes = (axes,)
    return tuple(a % x.ndim for a in axes)


class BaseMetricPallas:
    """Pallas port of torchimage BaseMetric with a squared-error forward_full."""

    def __init__(self, *, reduction="mean"):
        self.reduction = reduction

    # --- forward_full: runs fully inside Pallas ---------------------------
    def forward_full(self, y_pred, y_true):
        return sqerr_map(y_pred, y_true)

    # --- forward: mirrors BaseMetric.forward -------------------------------
    def forward(self, y_pred, y_true, reduce_axes=None):
        assert y_pred.shape == y_true.shape
        axes = check_axes(y_pred, reduce_axes)

        if self.reduction == "none":
            return self.forward_full(y_pred, y_true)
        if self.reduction not in ("mean", "sum"):
            raise ValueError(f"Unknown reduction mode: {self.reduction}")

        ndim = y_pred.ndim
        axes_sorted = tuple(sorted(set(axes)))
        keep_axes = tuple(a for a in range(ndim) if a not in axes_sorted)
        keep_shape = tuple(y_pred.shape[a] for a in keep_axes)
        out_dtype = _out_float_dtype(y_pred, y_true)

        G = math.prod(keep_shape) if keep_shape else 1
        G = max(G, 1)
        L = y_pred.size // G if G else 0

        if axes_sorted and L >= 256:
            # Fused path: arrange kept axes leading, reduced axes trailing,
            # reshape to (G, L) and reduce inside Pallas (no full map to HBM).
            perm = keep_axes + axes_sorted
            if perm == tuple(range(ndim)):
                yp, yt = y_pred, y_true           # already kept-leading
            else:
                yp = jnp.transpose(y_pred, perm)  # one copy; still beats the
                yt = jnp.transpose(y_true, perm)  # full f32 map round trip
            sums = sqerr_group_sums(yp.reshape(G, L), yt.reshape(G, L))
            if self.reduction == "mean":
                sums = sums / jnp.float32(L)
            return sums.astype(out_dtype).reshape(keep_shape)

        # Tiny reduced extent (or empty axes): Pallas score map, then a cheap
        # axis reduction as XLA glue.
        x = self.forward_full(y_pred, y_true)
        if self.reduction == "mean":
            return jnp.mean(x, axis=axes_sorted)
        return jnp.sum(x, axis=axes_sorted)

    __call__ = forward


if __name__ == "__main__":
    key = jax.random.PRNGKey(0)
    k1, k2, k3, k4 = jax.random.split(key, 4)
    shape = (2, 4, 16, 16)  # N, C, H, W
    y_pred = jax.random.uniform(k1, shape, dtype=jnp.float32)
    y_true = jax.random.uniform(k2, shape, dtype=jnp.float32)
    ref_full = (y_pred - y_true) ** 2

    metric_mean = BaseMetricPallas(reduction="mean")
    metric_sum = BaseMetricPallas(reduction="sum")
    metric_none = BaseMetricPallas(reduction="none")

    # reduction='mean', axes=None -> scalar (default BaseMetric behaviour)
    out_mean = jax.block_until_ready(metric_mean(y_pred, y_true))

    # reduction='sum', axes over content dims -> per-sample scores (N,)
    out_per_sample = jax.block_until_ready(
        metric_sum(y_pred, y_true, reduce_axes=(1, 2, 3)))

    # reduction='none' -> full score map, same shape as input
    out_full = jax.block_until_ready(metric_none(y_pred, y_true))

    # non-trailing reduction -> transpose + fused partial-sum kernel path
    out_keep_c = jax.block_until_ready(
        metric_mean(y_pred, y_true, reduce_axes=(0, 2, 3)))

    # tiny reduced extent -> map + XLA-reduce fallback path
    out_fb = jax.block_until_ready(metric_sum(y_pred, y_true, reduce_axes=0))

    # unaligned shape -> minimal pad + in-kernel tail masking paths
    shp2 = (2, 3, 7, 9)
    a = jax.random.uniform(k3, shp2, dtype=jnp.float32)
    b = jax.random.uniform(k4, shp2, dtype=jnp.float32)
    ref2 = (a - b) ** 2
    out2_mean = jax.block_until_ready(metric_mean(a, b))
    out2_full = jax.block_until_ready(metric_none(a, b))

    # silent correctness checks against pure-JAX reference
    assert out_full.shape == shape
    assert out_per_sample.shape == (2,)
    assert out_mean.shape == ()
    assert out_keep_c.shape == (4,)
    assert out_fb.shape == (4, 16, 16)
    assert out2_full.shape == shp2
    assert jnp.allclose(out_full, ref_full, atol=1e-6)
    assert jnp.allclose(out_mean, jnp.mean(ref_full), atol=1e-5)
    assert jnp.allclose(out_per_sample, jnp.sum(ref_full, axis=(1, 2, 3)),
                        atol=1e-4)
    assert jnp.allclose(out_keep_c, jnp.mean(ref_full, axis=(0, 2, 3)),
                        atol=1e-5)
    assert jnp.allclose(out_fb, jnp.sum(ref_full, axis=0), atol=1e-5)
    assert jnp.allclose(out2_full, ref2, atol=1e-6)
    assert jnp.allclose(out2_mean, jnp.mean(ref2), atol=1e-5)

    print("KERNEL_OK")
</pallas_src>

<mosaic_0001>
module attributes {stable_mosaic.version = 11 : i64} {
  func.func @kernel(%arg0: i32, %arg1: i32, %arg2: memref<1x8x128xf32, #tpu.memory_space<vmem>>, %arg3: memref<1x8x128xf32, #tpu.memory_space<vmem>>, %arg4: memref<1x1x8x128xf32, #tpu.memory_space<vmem>>) attributes {dimension_semantics = [#tpu.dimension_semantics<parallel>, #tpu.dimension_semantics<parallel>], iteration_bounds = array<i64: 1, 2>, scalar_prefetch = 0 : i64, scratch_operands = 0 : i64, tpu.core_type = #tpu.core_type<tc>, window_params = [{transform_indices = @transform_0, window_bounds = array<i64: 1, 8, 128>}, {transform_indices = @transform_1, window_bounds = array<i64: 1, 8, 128>}, {transform_indices = @transform_2, window_bounds = array<i64: 1, 1, 8, 128>}]} {
    %c0 = arith.constant 0 : index
    %c0_0 = arith.constant 0 : index
    %c0_1 = arith.constant 0 : index
    %0 = vector.load %arg2[%c0, %c0_0, %c0_1] : memref<1x8x128xf32, #tpu.memory_space<vmem>>, vector<1x8x128xf32>
    %1 = vector.shape_cast %0 : vector<1x8x128xf32> to vector<8x128xf32>
    %c0_2 = arith.constant 0 : index
    %c0_3 = arith.constant 0 : index
    %c0_4 = arith.constant 0 : index
    %2 = vector.load %arg3[%c0_2, %c0_3, %c0_4] : memref<1x8x128xf32, #tpu.memory_space<vmem>>, vector<1x8x128xf32>
    %3 = vector.shape_cast %2 : vector<1x8x128xf32> to vector<8x128xf32>
    %4 = arith.subf %1, %3 : vector<8x128xf32>
    %5 = arith.mulf %4, %4 : vector<8x128xf32>
    %6 = vector.shape_cast %5 : vector<8x128xf32> to vector<1x8x128xf32>
    %cst = arith.constant dense<0.000000e+00> : vector<8x128xf32>
    %7 = vector.multi_reduction <add>, %6, %cst [0] : vector<1x8x128xf32> to vector<8x128xf32>
    %c0_5 = arith.constant 0 : index
    %c0_6 = arith.constant 0 : index
    %c0_7 = arith.constant 0 : index
    %c0_8 = arith.constant 0 : index
    %8 = vector.load %arg4[%c0_5, %c0_6, %c0_7, %c0_8] : memref<1x1x8x128xf32, #tpu.memory_space<vmem>>, vector<1x1x8x128xf32>
    %9 = vector.shape_cast %8 : vector<1x1x8x128xf32> to vector<8x128xf32>
    %10 = vector.shape_cast %7 : vector<8x128xf32> to vector<1x1x8x128xf32>
    tpu.vector_store %arg4[%c0_5, %c0_6, %c0_7, %c0_8], %10 {strides = array<i32>} : memref<1x1x8x128xf32, #tpu.memory_space<vmem>>, vector<1x1x8x128xf32>,
    return
  }
  func.func @transform_0(%arg0: i32, %arg1: i32) -> (i32, i32, i32) {
    %c0_i32 = arith.constant 0 : i32
    %c0_i32_0 = arith.constant 0 : i32
    return %arg0, %arg1, %c0_i32 : i32, i32, i32
  }
  func.func @transform_1(%arg0: i32, %arg1: i32) -> (i32, i32, i32) {
    %c0_i32 = arith.constant 0 : i32
    %c0_i32_0 = arith.constant 0 : i32
    return %arg0, %arg1, %c0_i32 : i32, i32, i32
  }
  func.func @transform_2(%arg0: i32, %arg1: i32) -> (i32, i32, i32, i32) {
    %c0_i32 = arith.constant 0 : i32
    %c0_i32_0 = arith.constant 0 : i32
    %c0_i32_1 = arith.constant 0 : i32
    return %arg0, %arg1, %c0_i32, %c0_i32_0 : i32, i32, i32, i32
  }
}

</mosaic_0001>

<bundles_post_ra>
// kernel: tpu_custom_call.1
= control target key start
LH: loop header
LB: loop body
LE: loop exit
PB: predicated region body
PF: predicated region fallthrough
CT: control target
= control target key end

     0   :  { %7 = vsyncpa [#allocation3], 0  ;;  %s727_s0 = inlined_call_operand.hbm [shape: f32[1,16,128], index: 0, kind: input, shape index: {}]   ;;  %s728_s1 = inlined_call_operand.hbm [shape: f32[1,16,128], index: 1, kind: input, shape index: {}]   ;;  %s729_s2 = inlined_call_operand.hbm [shape: f32[1,2,8,128], index: 2, kind: output, shape index: {}]  }
   0x1   :  { %9 = vsyncpa [#allocation3 + $0x1], 0 }
   0x2   :  { %10 = vsyncpa [#allocation6], 0 }
   0x3   :  { %12 = vsyncpa [#allocation6 + $0x1], 0 }
   0x4   :  { %13 = vsyncpa [#allocation4], 0 }
   0x5   :  { %15 = vsyncpa [#allocation4 + $0x1], 0  ;;  %s599_s9 = smov 0   ;;  %s601_s10 = smov 0  }
   0x6   :  { %s603_s11 = smov 0   ;;  %s605_s12 = smov 0  }
   0x7   :  { %s607_s13 = smov 0   ;;  %s609_s14 = smov 0  }
   0x8 LB: > { %s353_s15 = sadd.s32 4294967295, %s582_s14   ;;  %s354_s16 = sadd.s32 4294967294, %s582_s14   ;;  %s582_s14 = sphi %s609_s14, %s21_s14   ;;  %s578_s13 = sphi %s607_s13, %s738_s13   ;;  %s574_s12 = sphi %s605_s12, %s737_s12   ;;  %s570_s11 = sphi %s603_s11, %s736_s11   ;;  %s566_s10 = sphi %s601_s10, %s735_s10   ;;  %s562_s9 = sphi %s599_s9, %s734_s9  }
   0x9   : > { %s30_s17 = sadd.s32 1, %s578_s13  ;;  %s42_s18 = sadd.s32 1, %s570_s11 }
   0xa   : > { %p31_p0 = scmp.ge.s32.totalorder %s30_s17, 2  ;;  %p49_p1 = scmp.ne.s32.totalorder %s570_s11, %s566_s10 }
   0xb   : > { %p50_p2 = scmp.eq.s32.totalorder %s582_s14, 0  ;;  %p55_p3 = scmp.ne.s32.totalorder %s566_s10, %s562_s9 }
   0xc   : > { %s740_s17 = smov (%p31_p0, %s30_s17), 0  ;;  %p56_p5 = scmp.eq.s32.totalorder %s353_s15, 0 }
   0xd   : > { %p640_p4 = por %p50_p2, %p49_p1  ;;  %s38_s20 = ssub.s32 %s578_s13, %s740_s17 }
   0xe   : > { %p109_p6 = scmp.eq.s32.totalorder %s353_s15, 1  ;;  %p40_p7 = scmp.eq.s32.totalorder %s38_s20, 0 }
   0xf   : > { %p646_p8 = por %p56_p5, %p55_p3  ;;  %p115_p10 = scmp.eq.s32.totalorder %s354_s16, 1 }
  0x10   : > { %p650_p9 = por %p109_p6, %p49_p1  ;;  %p356_p12 = scmp.ge.s32.totalorder %s582_s14, 2 }
  0x11   : > { %s655_s23 = scalar_select %p40_p7, %s570_s11, %s42_s18  }
  0x12   : > { %p657_p11 = por %p115_p10, %p55_p3  ;;  %p386_p13 = scmp.lt.s32.totalorder %s582_s14, 2 }
  0x13   : > { %s135_s25 = sand.u32 1, %s570_s11   ;;  %s358_s27 = sshll.u32 %s578_s13, 3 }
  0x14   : > { %s357_s26 = sshll.u32 %s135_s25, 3  ;;  %s145_s30 = scalar_lea.hbm %s727_s0, %s358_s27 }
  0x15   : > { %s139_s3 = scalar_lea.vmem [#allocation2], %s357_s26  ;;  %s147_s5 = sshll.u32 %s145_s30, 4  ;;  %s148_s5 = int_to_ptr.hbm [resolvable:$true] %s147_s5 }
  0x16   : > { %s149_s4 = sshll.u32 %s139_s3, 4  ;;  %p376_p0 = pnand %p386_p13, %p640_p4  ;;  %s150_s4 = int_to_ptr.vmem [resolvable:$true] %s149_s4 }
  0x17   : > { %p361_p1 = scmp.ge.s32.totalorder %s582_s14, 1  ;;  %p175_p2 = scmp.lt.s32.totalorder %s582_s14, 3 }
  0x18   : > { %s136_s6 = scalar_lea.sflag [#allocation3], %s135_s25  ;;  %s166_s15 = scalar_lea.hbm %s728_s1, %s358_s27 }
  0x19   : > { %378 = dma.hbm_to_vmem [thread:$0]  (!%p376_p0), %s148_s5, 128, %s150_s4, %s136_s6  }
  0x1a   : > { %p176_p3 = pnand %p361_p1, %p175_p2  ;;  %s160_s16 = scalar_lea.vmem [#allocation5], %s357_s26 }
  0x1b   : > { %s170_s18 = sshll.u32 %s160_s16, 4  ;;  %s168_s20 = sshll.u32 %s166_s15, 4  ;;  %s171_s18 = int_to_ptr.vmem [resolvable:$true] %s170_s18  ;;  %s169_s20 = int_to_ptr.hbm [resolvable:$true] %s168_s20 }
  0x1c   : > { %s157_s28 = scalar_lea.sflag [#allocation6], %s135_s25  ;;  %179 = sbr.rel (%p176_p3) target bundleno = 51 (0x33), region = 28 }
  0x1d   : > { %381 = dma.hbm_to_vmem [thread:$0]  (!%p376_p0), %s169_s20, 128, %s171_s18, %s157_s28  }
  0x1e   : > { %s676_s19 = sand.u32 (!%p176_p3), 1, %s566_s10  }
  0x1f   : > { %s362_s29 = sshll.u32 (!%p176_p3), %s676_s19, 3  ;;  %s182_s30 = scalar_lea.sflag (!%p176_p3), [#allocation3], %s676_s19 }
  0x20   : > { %s185_s3 = scalar_lea.vmem (!%p176_p3), [#allocation2], %s362_s29 }
  0x21   : > { %549 = dma.done.wait (%p646_p8), %s182_s30, 128  }
  0x22   : > { %551 = vsyncadd (%p646_p8), %s182_s30, 4294967168  ;;  %s192_s26 = scalar_lea.sflag [#allocation6], %s676_s19  ;;  %s195_s25 = scalar_lea.vmem [#allocation5], %s362_s29 }
  0x23   : > { %553 = dma.done.wait (%p646_p8), %s192_s26, 128  }
  0x24   : > { %555 = vsyncadd (%p646_p8), %s192_s26, 4294967168  ;;  %s366_s27 = sshll.u32 %s574_s12, 3  ;;  %v222_v0 = vld [vmem:[%s185_s3] sm:$0xff]  ;;  %v223_v1 = vld [vmem:[%s195_s25] sm:$0xff]  ;;  %s221_s7 = scalar_lea.vmem [#allocation7], %s362_s29 }
  0x25   : > { %s241_s6 = scalar_lea.hbm %s729_s2, %s366_s27  ;;  %s243_s8 = sshll.u32 %s221_s7, 4  ;;  %v224_v2 = vsub.f32 %v222_v0, %v223_v1  ;;  %s244_s8 = int_to_ptr.vmem [resolvable:$true] %s243_s8 }
  0x26   : > { %s245_s15 = sshll.u32 %s241_s6, 4  ;;  %s229_s21 = scalar_lea.sflag [#allocation4], %s676_s19  ;;  %s246_s15 = int_to_ptr.hbm [resolvable:$true] %s245_s15 }
  0x27   : > { %v225_v3 = vmul.f32 %v224_v2, %v224_v2  ;;  %s510_s16 = sshra.s32 %s246_s15, 4  ;;  %s516_s28 = scalar_lea.hbm %s729_s2, 16  ;;  %s511_s16 = int_to_ptr.hbm [resolvable:$true] %s510_s16 }
  0x28   : > { %s512_s18 = scalar_lea.hbm %s511_s16, 8  ;;  %p517_p7 = scmp.lt.s32.totalorder %s511_s16, %s729_s2 }
  0x29   : > { %227 = vst [vmem:[%s221_s7] sm:$0xff] %v225_v3  ;;  %p513_p4 = scmp.ne.s32.totalorder %s511_s16, %s512_s18  ;;  %p518_p8 = scmp.lt.s32.totalorder %s516_s28, %s512_s18 }
  0x2b   : > { %p514_p5 = pnand %p513_p4, %p650_p9  ;;  %p519_p10 = por %p518_p8, %p517_p7 }
  0x2d   : > { %p515_p6 = pneg %p514_p5 }
  0x2f   : > { %p520_p13 = pnand %p519_p10, %p515_p6 }
  0x31   : > { %523 = shalt.err (!%p520_p13)
}
  0x32   : > { %373 = dma.vmem_to_hbm [thread:$0]  (%p650_p9), %s244_s8, 128, %s246_s15, %s229_s21  }
  0x33 PF: > { %s257_s19 = sand.u32 1, %s562_s9   ;;  %p383_p0 = pnand %p356_p12, %p657_p11 }
  0x34   : > { %s258_s3 = scalar_lea.sflag [#allocation4], %s257_s19 }
  0x35   : > { %p384_p1 = pneg %p383_p0 }
  0x37   : > { %557 = dma.done.wait (%p384_p1), %s258_s3, 128  }
  0x38   : > { %559 = vsyncadd (%p384_p1), %s258_s3, 4294967168  ;;  %s21_s14 = sadd.s32 1, %s582_s14   ;;  %s734_s9 = smov %s566_s10 }
  0x39   : > { %p18_p2 = scmp.ge.s32.totalorder %s21_s14, 4   ;;  %s735_s10 = smov %s570_s11 }
  0x3a   : > { %s736_s11 = smov %s655_s23  ;;  %s737_s12 = smov %s578_s13 }
  0x3b   : > { %s738_s13 = smov %s740_s17  ;;  %20 = sbr.rel (!%p18_p2) target bundleno = 8 (0x8), region = 86 }
  0x40   :  { %264 = vsyncpa [#allocation3], 1 }
  0x41   :  { %266 = vsyncpa [#allocation3 + $0x1], 1 }
  0x42   :  { %267 = vsyncpa [#allocation6], 1 }
  0x43   :  { %269 = vsyncpa [#allocation6 + $0x1], 1 }
  0x44   :  { %270 = vsyncpa [#allocation4], 1 }
  0x45   :  { %272 = vsyncpa [#allocation4 + $0x1], 1 }

</bundles_post_ra>
